<compile_context>
chip_gen: v5e
topology: v5e:2x2
jax: 0.10.0
libtpu: 0.0.40
codegen_flags: <defaults>
</compile_context>

<pallas_src>
import functools
import math

import jax
import jax.numpy as jnp
from jax import lax
from jax.experimental import pallas as pl
from jax.experimental.pallas import tpu as pltpu

_LANE = 128


def _round_up(x, m):
    return (x + m - 1) // m * m


def _ac_kernel(n_actions, x_ref, w1_ref, b1_ref, wh_ref, bh_ref,
               wa2_ref, wc2_ref, bo_ref, out_ref):
    # Trunk: Linear(input_size, 256) + ReLU.  x cast to bf16 in-kernel (hidden
    # under the MXU), f32 accumulate, f32 bias/ReLU epilogue.
    xb = x_ref[...].astype(jnp.bfloat16)
    h = jnp.dot(xb, w1_ref[...], preferred_element_type=jnp.float32) + b1_ref[...]
    h = jnp.maximum(h, 0.0)

    # Fused head layer 1: 256 -> 1024  ( [actor 512 | critic 512] ), + ReLU.
    hz = jnp.dot(h.astype(jnp.bfloat16), wh_ref[...],
                 preferred_element_type=jnp.float32) + bh_ref[...]
    hz = jnp.maximum(hz, 0.0)

    # Actor head layer 2 on the MXU: K=512 (actor half only), N padded to 128.
    # Columns >= n_actions of wa2/bo are zero; column n_actions holds bc2.
    pre = jnp.dot(hz[:, :512].astype(jnp.bfloat16), wa2_ref[...],
                  preferred_element_type=jnp.float32) + bo_ref[...]

    # Critic head layer 2 on the VPU (broadcast mul) + XLU (lane reduction):
    # 512 -> 1, f32 end to end.  These slots are free while the MXU is busy.
    c_pre = jnp.sum(hz[:, 512:] * wc2_ref[...], axis=-1, keepdims=True)   # (tm, 1)

    # Merge the critic value into lane n_actions, then one lane-dense store.
    col = lax.broadcasted_iota(jnp.int32, pre.shape, 1)
    pre = jnp.where(col == n_actions, pre + c_pre, pre)
    out_ref[...] = jnp.maximum(pre, 0.0).astype(out_ref.dtype)


def pack_params(p, n_actions):
    """Fuse/pad the per-layer params into the kernel's packed layout (done once).

      wh  = [wa1 | wc1]                      -> [256, 1024] bf16
      bh  = [ba1 | bc1]                      -> [1, 1024]   f32
      wa2 = wa2 zero-padded on N to 128      -> [512, 128]  bf16
      wc2 = critic output weight as a row    -> [1, 512]    f32  (VPU path)
      bo  = [ba2 | bc2 | 0...]               -> [1, 128]    f32
    """
    bf16 = jnp.bfloat16
    n_out = n_actions + 1
    n_pad = _round_up(n_out, _LANE)

    w1 = p["w1"].astype(bf16)
    b1 = p["b1"].astype(jnp.float32)

    wh = jnp.concatenate([p["wa1"], p["wc1"]], axis=1).astype(bf16)          # [256, 1024]
    bh = jnp.concatenate([p["ba1"], p["bc1"]], axis=1).astype(jnp.float32)   # [1, 1024]

    wa2 = jnp.zeros((512, n_pad), jnp.float32)
    wa2 = wa2.at[:, :n_actions].set(p["wa2"]).astype(bf16)                   # [512, n_pad]

    wc2 = p["wc2"].reshape(1, 512).astype(jnp.float32)                       # [1, 512]

    bo = jnp.zeros((1, n_pad), jnp.float32)
    bo = bo.at[:, :n_actions].set(p["ba2"])
    bo = bo.at[:, n_actions:n_out].set(p["bc2"])                             # critic bias

    return dict(w1=w1, b1=b1, wh=wh, bh=bh, wa2=wa2, wc2=wc2, bo=bo,
                n_actions=n_actions, n_pad=n_pad)


def _choose_tile(batch, tile_m):
    """Batch tile: tiny batches use one round_up(B,8) tile; large batches use
    tiles that are multiples of 256 (fills v6e/v7x 2x256 MXU rows) capped at
    ceil(B/2) so the 'parallel' grid has >= 2 steps (both v7x TensorCores)."""
    b8 = _round_up(batch, 8)
    if b8 <= 256:
        return b8
    half = _round_up(pl.cdiv(b8, 2), 256)
    return min(_round_up(tile_m, 256), half)


def discrete_actor_critic_forward(x, packed, *, tile_m=1024, out_dtype=jnp.float32):
    """x: [B, input_size] float32.  packed: output of pack_params.
    Returns (actor [B, n_actions], critic [B, 1]) in float32.
    Set out_dtype=jnp.bfloat16 on v5e to halve output writeback if bf16 logits
    are acceptable."""
    B, in_dim = x.shape
    n_actions = packed["n_actions"]
    n_pad = packed["n_pad"]

    tm = _choose_tile(B, tile_m)
    grid = pl.cdiv(B, tm)
    out_rows = grid * tm        # full output blocks -> no masked stores

    # Weights/biases: constant block index -> DMA'd once, VMEM-resident across
    # all batch tiles.  (pipeline_mode=pl.Buffered(1) would shave ~0.8 MB of
    # double-buffer VMEM but is not needed at this working-set size.)
    def weight_spec(a):
        return pl.BlockSpec(a.shape, lambda i: (0,) * a.ndim)

    kernel = functools.partial(_ac_kernel, n_actions)

    out = pl.pallas_call(
        kernel,
        out_shape=jax.ShapeDtypeStruct((out_rows, n_pad), out_dtype),
        grid=(grid,),
        in_specs=[
            pl.BlockSpec((tm, in_dim), lambda i: (i, 0)),
            weight_spec(packed["w1"]), weight_spec(packed["b1"]),
            weight_spec(packed["wh"]), weight_spec(packed["bh"]),
            weight_spec(packed["wa2"]), weight_spec(packed["wc2"]),
            weight_spec(packed["bo"]),
        ],
        out_specs=pl.BlockSpec((tm, n_pad), lambda i: (i, 0)),
        compiler_params=pltpu.CompilerParams(
            dimension_semantics=("parallel",),
            vmem_limit_bytes=32 * 1024 * 1024,
        ),
    )(x, packed["w1"], packed["b1"], packed["wh"], packed["bh"],
      packed["wa2"], packed["wc2"], packed["bo"])

    # Padded rows (from the ragged last tile) are sliced off here; no
    # batch-dependent state is ever written from them.
    actor = out[:B, :n_actions].astype(jnp.float32)
    critic = out[:B, n_actions:n_actions + 1].astype(jnp.float32)
    return actor, critic


def init_params(key, input_size, n_actions):
    """PyTorch nn.Linear default init: U(-1/sqrt(fan_in), 1/sqrt(fan_in)).
    Weights stored as [in, out] (transposed vs. PyTorch's [out, in])."""
    def linear(key, fan_in, fan_out):
        kw, kb = jax.random.split(key)
        bound = 1.0 / math.sqrt(fan_in)
        w = jax.random.uniform(kw, (fan_in, fan_out), jnp.float32, -bound, bound)
        b = jax.random.uniform(kb, (1, fan_out), jnp.float32, -bound, bound)
        return w, b

    keys = jax.random.split(key, 5)
    w1, b1 = linear(keys[0], input_size, 256)
    wa1, ba1 = linear(keys[1], 256, 512)
    wa2, ba2 = linear(keys[2], 512, n_actions)
    wc1, bc1 = linear(keys[3], 256, 512)
    wc2, bc2 = linear(keys[4], 512, 1)
    return dict(w1=w1, b1=b1, wa1=wa1, ba1=ba1, wa2=wa2, ba2=ba2,
                wc1=wc1, bc1=bc1, wc2=wc2, bc2=bc2)


def reference_forward(x, p):
    """Pure-JAX reference mirroring the kernel's precision choices:
    bf16 matmul operands with f32 accumulation for the MXU matmuls, and a
    full-f32 VPU/XLU path for the critic's final 512->1 reduction."""
    bf16 = jnp.bfloat16
    relu = lambda v: jnp.maximum(v, 0.0)
    mm = lambda a, w: jnp.dot(a.astype(bf16), w.astype(bf16),
                              preferred_element_type=jnp.float32)
    h = relu(mm(x, p["w1"]) + p["b1"])
    hz_a = relu(mm(h, p["wa1"]) + p["ba1"])
    hz_c = relu(mm(h, p["wc1"]) + p["bc1"])
    actor = relu(mm(hz_a, p["wa2"]) + p["ba2"])
    critic = relu(jnp.sum(hz_c * p["wc2"].reshape(1, 512), axis=-1, keepdims=True)
                  + p["bc2"])
    return actor, critic


if __name__ == "__main__":
    key = jax.random.PRNGKey(0)
    k_params, k_x = jax.random.split(key)

    batch = 8
    input_size = 32
    n_actions = 8

    params = init_params(k_params, input_size, n_actions)
    packed = pack_params(params, n_actions)
    x = jax.random.normal(k_x, (batch, input_size), jnp.float32)

    actor, critic = discrete_actor_critic_forward(x, packed)
    actor, critic = jax.block_until_ready((actor, critic))

    ref_actor, ref_critic = reference_forward(x, params)
    assert actor.shape == (batch, n_actions)
    assert critic.shape == (batch, 1)
    assert jnp.allclose(actor, ref_actor, atol=1e-3, rtol=1e-3)
    assert jnp.allclose(critic, ref_critic, atol=1e-3, rtol=1e-3)

    print("KERNEL_OK")
</pallas_src>

<mosaic_0001>
module attributes {stable_mosaic.version = 11 : i64} {
  func.func @_ac_kernel(%arg0: i32, %arg1: memref<8x32xf32, #tpu.memory_space<vmem>>, %arg2: memref<32x256xbf16, #tpu.memory_space<vmem>>, %arg3: memref<1x256xf32, #tpu.memory_space<vmem>>, %arg4: memref<256x1024xbf16, #tpu.memory_space<vmem>>, %arg5: memref<1x1024xf32, #tpu.memory_space<vmem>>, %arg6: memref<512x128xbf16, #tpu.memory_space<vmem>>, %arg7: memref<1x512xf32, #tpu.memory_space<vmem>>, %arg8: memref<1x128xf32, #tpu.memory_space<vmem>>, %arg9: memref<8x128xf32, #tpu.memory_space<vmem>>) attributes {dimension_semantics = [#tpu.dimension_semantics<parallel>], iteration_bounds = array<i64: 1>, scalar_prefetch = 0 : i64, scratch_operands = 0 : i64, tpu.core_type = #tpu.core_type<tc>, window_params = [{transform_indices = @transform_0, window_bounds = array<i64: 8, 32>}, {pipeline_mode = #tpu.pipeline_mode<synchronous>, transform_indices = @transform_1, window_bounds = array<i64: 32, 256>}, {pipeline_mode = #tpu.pipeline_mode<synchronous>, transform_indices = @transform_2, window_bounds = array<i64: 1, 256>}, {pipeline_mode = #tpu.pipeline_mode<synchronous>, transform_indices = @transform_3, window_bounds = array<i64: 256, 1024>}, {pipeline_mode = #tpu.pipeline_mode<synchronous>, transform_indices = @transform_4, window_bounds = array<i64: 1, 1024>}, {pipeline_mode = #tpu.pipeline_mode<synchronous>, transform_indices = @transform_5, window_bounds = array<i64: 512, 128>}, {pipeline_mode = #tpu.pipeline_mode<synchronous>, transform_indices = @transform_6, window_bounds = array<i64: 1, 512>}, {pipeline_mode = #tpu.pipeline_mode<synchronous>, transform_indices = @transform_7, window_bounds = array<i64: 1, 128>}, {transform_indices = @transform_8, window_bounds = array<i64: 8, 128>}]} {
    %c0 = arith.constant 0 : index
    %c0_0 = arith.constant 0 : index
    %0 = vector.load %arg1[%c0, %c0_0] : memref<8x32xf32, #tpu.memory_space<vmem>>, vector<8x32xf32>
    %1 = arith.truncf %0 : vector<8x32xf32> to vector<8x32xbf16>
    %c0_1 = arith.constant 0 : index
    %c0_2 = arith.constant 0 : index
    %2 = vector.load %arg2[%c0_1, %c0_2] : memref<32x256xbf16, #tpu.memory_space<vmem>>, vector<32x256xbf16>
    %cst = arith.constant dense<0.000000e+00> : vector<8x256xf32>
    %3 = tpu.matmul %1, %2, %cst {dimension_numbers = #tpu.dot_dimension_numbers<[1], [0], [0], [1], [0, 0, 1, 1], [], []>} : vector<8x32xbf16>, vector<32x256xbf16>, vector<8x256xf32> -> vector<8x256xf32>
    %c0_3 = arith.constant 0 : index
    %c0_4 = arith.constant 0 : index
    %4 = vector.load %arg3[%c0_3, %c0_4] : memref<1x256xf32, #tpu.memory_space<vmem>>, vector<1x256xf32>
    %5 = vector.broadcast %4 : vector<1x256xf32> to vector<8x256xf32>
    %6 = arith.addf %3, %5 : vector<8x256xf32>
    %cst_5 = arith.constant 0.000000e+00 : f32
    %7 = vector.broadcast %cst_5 : f32 to vector<8x256xf32>
    %8 = arith.maximumf %6, %7 : vector<8x256xf32>
    %9 = arith.truncf %8 : vector<8x256xf32> to vector<8x256xbf16>
    %c0_6 = arith.constant 0 : index
    %c0_7 = arith.constant 0 : index
    %10 = vector.load %arg4[%c0_6, %c0_7] : memref<256x1024xbf16, #tpu.memory_space<vmem>>, vector<256x1024xbf16>
    %cst_8 = arith.constant dense<0.000000e+00> : vector<8x1024xf32>
    %11 = tpu.matmul %9, %10, %cst_8 {dimension_numbers = #tpu.dot_dimension_numbers<[1], [0], [0], [1], [0, 0, 1, 1], [], []>} : vector<8x256xbf16>, vector<256x1024xbf16>, vector<8x1024xf32> -> vector<8x1024xf32>
    %c0_9 = arith.constant 0 : index
    %c0_10 = arith.constant 0 : index
    %12 = vector.load %arg5[%c0_9, %c0_10] : memref<1x1024xf32, #tpu.memory_space<vmem>>, vector<1x1024xf32>
    %13 = vector.broadcast %12 : vector<1x1024xf32> to vector<8x1024xf32>
    %14 = arith.addf %11, %13 : vector<8x1024xf32>
    %cst_11 = arith.constant 0.000000e+00 : f32
    %15 = vector.broadcast %cst_11 : f32 to vector<8x1024xf32>
    %16 = arith.maximumf %14, %15 : vector<8x1024xf32>
    %17 = vector.extract_strided_slice %16 {offsets = [0, 0], sizes = [8, 512], strides = [1, 1]} : vector<8x1024xf32> to vector<8x512xf32>
    %18 = arith.truncf %17 : vector<8x512xf32> to vector<8x512xbf16>
    %c0_12 = arith.constant 0 : index
    %c0_13 = arith.constant 0 : index
    %19 = vector.load %arg6[%c0_12, %c0_13] : memref<512x128xbf16, #tpu.memory_space<vmem>>, vector<512x128xbf16>
    %cst_14 = arith.constant dense<0.000000e+00> : vector<8x128xf32>
    %20 = tpu.matmul %18, %19, %cst_14 {dimension_numbers = #tpu.dot_dimension_numbers<[1], [0], [0], [1], [0, 0, 1, 1], [], []>} : vector<8x512xbf16>, vector<512x128xbf16>, vector<8x128xf32> -> vector<8x128xf32>
    %c0_15 = arith.constant 0 : index
    %c0_16 = arith.constant 0 : index
    %21 = vector.load %arg8[%c0_15, %c0_16] : memref<1x128xf32, #tpu.memory_space<vmem>>, vector<1x128xf32>
    %22 = vector.broadcast %21 : vector<1x128xf32> to vector<8x128xf32>
    %23 = arith.addf %20, %22 : vector<8x128xf32>
    %24 = vector.extract_strided_slice %16 {offsets = [0, 512], sizes = [8, 512], strides = [1, 1]} : vector<8x1024xf32> to vector<8x512xf32>
    %c0_17 = arith.constant 0 : index
    %c0_18 = arith.constant 0 : index
    %25 = vector.load %arg7[%c0_17, %c0_18] : memref<1x512xf32, #tpu.memory_space<vmem>>, vector<1x512xf32>
    %26 = vector.broadcast %25 : vector<1x512xf32> to vector<8x512xf32>
    %27 = arith.mulf %24, %26 : vector<8x512xf32>
    %cst_19 = arith.constant dense<0.000000e+00> : vector<8xf32>
    %28 = vector.multi_reduction <add>, %27, %cst_19 [1] : vector<8x512xf32> to vector<8xf32>
    %29 = vector.shape_cast %28 : vector<8xf32> to vector<8x1xf32>
    %30 = tpu.iota {dimensions = array<i32: 1>} : vector<8x128xi32>
    %c8_i32 = arith.constant 8 : i32
    %31 = vector.broadcast %c8_i32 : i32 to vector<8x128xi32>
    %32 = arith.cmpi eq, %30, %31 : vector<8x128xi32>
    %33 = vector.broadcast %29 : vector<8x1xf32> to vector<8x128xf32>
    %34 = arith.addf %23, %33 : vector<8x128xf32>
    %35 = arith.select %32, %34, %23 : vector<8x128xi1>, vector<8x128xf32>
    %cst_20 = arith.constant 0.000000e+00 : f32
    %36 = vector.broadcast %cst_20 : f32 to vector<8x128xf32>
    %37 = arith.maximumf %35, %36 : vector<8x128xf32>
    %c0_21 = arith.constant 0 : index
    %c0_22 = arith.constant 0 : index
    %38 = vector.load %arg9[%c0_21, %c0_22] : memref<8x128xf32, #tpu.memory_space<vmem>>, vector<8x128xf32>
    tpu.vector_store %arg9[%c0_21, %c0_22], %37 {strides = array<i32>} : memref<8x128xf32, #tpu.memory_space<vmem>>, vector<8x128xf32>,
    return
  }
  func.func @transform_0(%arg0: i32) -> (i32, i32) {
    %c0_i32 = arith.constant 0 : i32
    %c0_i32_0 = arith.constant 0 : i32
    return %arg0, %c0_i32 : i32, i32
  }
  func.func @transform_1(%arg0: i32) -> (i32, i32) {
    %c0_i32 = arith.constant 0 : i32
    %c0_i32_0 = arith.constant 0 : i32
    %c0_i32_1 = arith.constant 0 : i32
    return %c0_i32, %c0_i32_0 : i32, i32
  }
  func.func @transform_2(%arg0: i32) -> (i32, i32) {
    %c0_i32 = arith.constant 0 : i32
    %c0_i32_0 = arith.constant 0 : i32
    %c0_i32_1 = arith.constant 0 : i32
    return %c0_i32, %c0_i32_0 : i32, i32
  }
  func.func @transform_3(%arg0: i32) -> (i32, i32) {
    %c0_i32 = arith.constant 0 : i32
    %c0_i32_0 = arith.constant 0 : i32
    %c0_i32_1 = arith.constant 0 : i32
    return %c0_i32, %c0_i32_0 : i32, i32
  }
  func.func @transform_4(%arg0: i32) -> (i32, i32) {
    %c0_i32 = arith.constant 0 : i32
    %c0_i32_0 = arith.constant 0 : i32
    %c0_i32_1 = arith.constant 0 : i32
    return %c0_i32, %c0_i32_0 : i32, i32
  }
  func.func @transform_5(%arg0: i32) -> (i32, i32) {
    %c0_i32 = arith.constant 0 : i32
    %c0_i32_0 = arith.constant 0 : i32
    %c0_i32_1 = arith.constant 0 : i32
    return %c0_i32, %c0_i32_0 : i32, i32
  }
  func.func @transform_6(%arg0: i32) -> (i32, i32) {
    %c0_i32 = arith.constant 0 : i32
    %c0_i32_0 = arith.constant 0 : i32
    %c0_i32_1 = arith.constant 0 : i32
    return %c0_i32, %c0_i32_0 : i32, i32
  }
  func.func @transform_7(%arg0: i32) -> (i32, i32) {
    %c0_i32 = arith.constant 0 : i32
    %c0_i32_0 = arith.constant 0 : i32
    %c0_i32_1 = arith.constant 0 : i32
    return %c0_i32, %c0_i32_0 : i32, i32
  }
  func.func @transform_8(%arg0: i32) -> (i32, i32) {
    %c0_i32 = arith.constant 0 : i32
    %c0_i32_0 = arith.constant 0 : i32
    return %arg0, %c0_i32 : i32, i32
  }
}

</mosaic_0001>

<bundles_post_ra>
// kernel: tpu_custom_call.1
= control target key start
LH: loop header
LB: loop body
LE: loop exit
PB: predicated region body
PF: predicated region fallthrough
CT: control target
= control target key end

     0   :  { %13 = vsyncpa [#allocation3], 0  ;;  %s2680_s0 = inlined_call_operand.hbm [shape: f32[8,32], index: 0, kind: input, shape index: {}]   ;;  %s2681_s1 = inlined_call_operand.hbm [shape: bf16[32,256], index: 1, kind: input, shape index: {}]   ;;  %s2682_s2 = inlined_call_operand.hbm [shape: f32[1,256], index: 2, kind: input, shape index: {}]   ;;  %s2683_s3 = inlined_call_operand.hbm [shape: bf16[256,1024], index: 3, kind: input, shape index: {}]   ;;  %s2684_s4 = inlined_call_operand.hbm [shape: f32[1,1024], index: 4, kind: input, shape index: {}]   ;;  %s2685_s5 = inlined_call_operand.hbm [shape: bf16[512,128], index: 5, kind: input, shape index: {}]   ;;  %s2686_s6 = inlined_call_operand.vmem [shape: f32[1,512], index: 6, kind: input, shape index: {}]   ;;  %s2687_s7 = inlined_call_operand.vmem [shape: f32[1,128], index: 7, kind: input, shape index: {}]   ;;  %s2688_s8 = inlined_call_operand.hbm [shape: f32[8,128], index: 8, kind: output, shape index: {}]  }
   0x1   :  { %14 = vsyncpa [#allocation6], 0 }
   0x2   :  { %15 = vsyncpa [#allocation9], 0 }
   0x3   :  { %16 = vsyncpa [#allocation12], 0  ;;  %s33_s29 = sshll.u32 %s2681_s1, 4  ;;  %s34_s29 = int_to_ptr.hbm [resolvable:$true] %s33_s29 }
   0x4   :  { %17 = vsyncpa [#allocation4], 0  ;;  %s2563_s30 = smov [#allocation5]   ;;  %s57_s12 = sshll.u32 %s2683_s3, 4  ;;  %s58_s12 = int_to_ptr.hbm [resolvable:$true] %s57_s12 }
   0x5   :  { %s35_s9 = sshll.u32 %s2563_s30, 4  ;;  %s2564_s13 = smov 128   ;;  %s36_s9 = int_to_ptr.vmem [resolvable:$true] %s35_s9 }
   0x6   :  { %s2565_s14 = smov 8   ;;  %s2566_s15 = smov [#allocation8]  }
   0x7   :  { %41 = dma.hbm_to_vmem [thread:$0]  %s34_s29, 512, %s36_s9, [#allocation6], %s2564_s13, %s2564_s13, %s2565_s14  }
   0x8   :  { %s59_s16 = sshll.u32 %s2566_s15, 4  ;;  %s2567_s17 = smov 512   ;;  %s60_s16 = int_to_ptr.vmem [resolvable:$true] %s59_s16 }
   0x9   :  { %s2568_s18 = smov 32   ;;  %s23_s20 = sshll.u32 %s2680_s0, 4  ;;  %s24_s20 = int_to_ptr.hbm [resolvable:$true] %s23_s20 }
   0xa   :  { %65 = dma.hbm_to_vmem [thread:$0]  %s58_s12, 16384, %s60_s16, [#allocation9], %s2567_s17, %s2567_s17, %s2568_s18  }
   0xb   :  { %s2569_s21 = smov [#allocation2]   ;;  %s47_s24 = sshll.u32 %s2682_s2, 4  ;;  %s48_s24 = int_to_ptr.hbm [resolvable:$true] %s47_s24 }
   0xc   :  { %s25_s22 = sshll.u32 %s2569_s21, 4  ;;  %s2570_s25 = smov [#allocation7]   ;;  %s26_s22 = int_to_ptr.vmem [resolvable:$true] %s25_s22 }
   0xd   :  { %28 = dma.hbm_to_vmem [thread:$0]  %s24_s20, 128, %s26_s22, [#allocation3]  }
   0xe   :  { %s49_s26 = sshll.u32 %s2570_s25, 4  ;;  %s71_s29 = sshll.u32 %s2684_s4, 4  ;;  %s50_s26 = int_to_ptr.vmem [resolvable:$true] %s49_s26  ;;  %s72_s29 = int_to_ptr.hbm [resolvable:$true] %s71_s29 }
   0xf   :  { %52 = dma.hbm_to_vmem [thread:$0]  %s48_s24, 32, %s50_s26, [#allocation6]  }
  0x10   :  { %s81_s9 = sshll.u32 %s2685_s5, 4  ;;  %s2571_s10 = smov [#allocation10]   ;;  %s82_s9 = int_to_ptr.hbm [resolvable:$true] %s81_s9 }
  0x11   :  { %s73_s11 = sshll.u32 %s2571_s10, 4  ;;  %s2572_s2 = smov [#allocation11]   ;;  %s74_s11 = int_to_ptr.vmem [resolvable:$true] %s73_s11 }
  0x12   :  { %76 = dma.hbm_to_vmem [thread:$0]  %s72_s29, 128, %s74_s11, [#allocation9]  }
  0x13   :  { %s83_s12 = sshll.u32 %s2572_s2, 4  ;;  %s2573_s13 = smov 64   ;;  %s84_s12 = int_to_ptr.vmem [resolvable:$true] %s83_s12 }
  0x14   :  { %s2574_s14 = smov 4  }
  0x15   :  { %89 = dma.hbm_to_vmem [thread:$0]  %s82_s9, 4096, %s84_s12, [#allocation12], %s2573_s13, %s2573_s13, %s2574_s14  }
  0x16   :  { %2553 = dma.done.wait [#allocation3], 128  }
  0x17   :  { %2554 = vsyncadd [#allocation3], 4294967168 }
  0x18   :  { %2555 = dma.done.wait [#allocation6], 544  }
  0x19   :  { %2556 = vsyncadd [#allocation6], 4294966752 }
  0x1a   :  { %2557 = dma.done.wait [#allocation9], 16512  }
  0x1b   :  { %2558 = vsyncadd [#allocation9], 4294950784 }
  0x1c   :  { %2559 = dma.done.wait [#allocation12], 4096  }
  0x1d   :  { %2560 = vsyncadd [#allocation12], 4294963200  ;;  %v1559_v0 = vld [vmem:[#allocation5 + $0x10] sm:$0xf]  ;;  %v2210_v1 = vld [vmem:[#allocation5 + $0x14] sm:$0xf0] }
  0x1e   :  { %v2209_v2 = vld [vmem:[#allocation5 + $0x14] sm:$0xf]  ;;  %v1560_v3 = vor.u32 %v2210_v1, %v1559_v0  ;;  %v1561_v4 = vld [vmem:[#allocation5 + $0x18] sm:$0xf0]  ;;  %v1551_v5 = vld [vmem:[#allocation5] sm:$0xf] }
  0x1f   :  { %v2208_v6 = vld [vmem:[#allocation5 + $0x4] sm:$0xf0]  ;;  %v1564_v7 = vor.u32 %v2209_v2, %v1561_v4  ;;  %v2207_v8 = vld [vmem:[#allocation5 + $0x4] sm:$0xf]  ;;  %v1553_v9 = vld [vmem:[#allocation5 + $0x8] sm:$0xf0] }
  0x20   :  { %v119_v10 = vld [vmem:[#allocation2] sm:$0xff]  ;;  %vm151_vm0 = vcmask 261120   ;;  %161 = vmatpush.bf16.msra.mxu0 %v1560_v3  ;;  %v1552_v11 = vor.u32 %v2208_v6, %v1551_v5  ;;  %v1793_v12 = vld [vmem:[#allocation8 + $0x1c0] sm:$0xf]  ;;  %v1556_v15 = vor.u32 %v2207_v8, %v1553_v9  ;;  %v2267_v18 = vld [vmem:[#allocation8 + $0x1c4] sm:$0xf] }
  0x21   :  { %v2271_v13 = vld [vmem:[#allocation8 + $0x1dc] sm:$0xf0]  ;;  %174 = vmatpush.bf16.msra.mxu1 %v1564_v7  ;;  %v1795_v19 = vld [vmem:[#allocation8 + $0x1e0] sm:$0xf0]  ;;  %v120_v25 = vpack.c.bf16 %v119_v10, %v119_v10  ;;  %s2575_s16 = smov [#allocation13]   ;;  %s1536_s19 = sshll.u32 %s2688_s8, 4  ;;  %s1537_s19 = int_to_ptr.hbm [resolvable:$true] %s1536_s19 }
  0x22   :  { %v2049_v14 = vld [vmem:[#allocation8 + $0x3c0] sm:$0xf]  ;;  %v1794_v16 = vor.u32 %v2271_v13, %v1793_v12  ;;  %v1798_v21 = vor.u32 %v2267_v18, %v1795_v19  ;;  %v2331_v22 = vld [vmem:[#allocation8 + $0x3c4] sm:$0xf]  ;;  %s1534_s17 = sshll.u32 %s2575_s16, 4  ;;  %s1535_s17 = int_to_ptr.vmem [resolvable:$true] %s1534_s17 }
  0x23   :  { %v2335_v17 = vld [vmem:[#allocation8 + $0x3dc] sm:$0xf0]  ;;  %v2051_v23 = vld [vmem:[#allocation8 + $0x3e0] sm:$0xf0] }
  0x24   :  { %v2050_v20 = vor.u32 %v2335_v17, %v2049_v14  ;;  %v1761_v24 = vld [vmem:[#allocation8 + $0x180] sm:$0xf]  ;;  %971 = vmatpush.bf16.msra.mxu2 %v1794_v16  ;;  %v2054_v26 = vor.u32 %v2331_v22, %v2051_v23  ;;  %162 = vmatpush.bf16.msra.mxu0 %v1552_v11  ;;  %v2259_v32 = vld [vmem:[#allocation8 + $0x184] sm:$0xf] }
  0x25   :  { %v2263_v27 = vld [vmem:[#allocation8 + $0x19c] sm:$0xf0]  ;;  %v1763_v33 = vld [vmem:[#allocation8 + $0x1a0] sm:$0xf0]  ;;  %175 = vmatpush.bf16.msra.mxu1 %v1556_v15 }
  0x26   :  { %v2017_v28 = vld [vmem:[#allocation8 + $0x380] sm:$0xf]  ;;  %984 = vmatpush.bf16.msra.mxu3 %v2050_v20  ;;  %v1762_v30 = vor.u32 %v2263_v27, %v1761_v24  ;;  %v2323_v34 = vld [vmem:[#allocation8 + $0x384] sm:$0xf]  ;;  %v1766_v35 = vor.u32 %v2259_v32, %v1763_v33 }
  0x27   :  { %v2327_v29 = vld [vmem:[#allocation8 + $0x39c] sm:$0xf0]  ;;  %v2019_v36 = vld [vmem:[#allocation8 + $0x3a0] sm:$0xf0]  ;;  %1565 = vmatmul.msk.bf16.vlgmr.msra.gmra.mxu0 %vm151_vm0, %v120_v25 }
  0x28   :  { %v2018_v31 = vor.u32 %v2327_v29, %v2017_v28  ;;  %997 = vmatpush.bf16.msrb.mxu0 %v1798_v21  ;;  %v1729_v37 = vld [vmem:[#allocation8 + $0x140] sm:$0xf]  ;;  %v2022_v39 = vor.u32 %v2323_v34, %v2019_v36  ;;  %v2251_v42 = vld [vmem:[#allocation8 + $0x144] sm:$0xf]  ;;  %972 = vmatpush.bf16.msra.mxu2 %v1762_v30 }
  0x29   :  { %v2255_v38 = vld [vmem:[#allocation8 + $0x15c] sm:$0xf0]  ;;  %1010 = vmatpush.bf16.msrb.mxu1 %v2054_v26  ;;  %v1731_v44 = vld [vmem:[#allocation8 + $0x160] sm:$0xf0] }
  0x2a   :  { %v1985_v40 = vld [vmem:[#allocation8 + $0x340] sm:$0xf]  ;;  %v1730_v43 = vor.u32 %v2255_v38, %v1729_v37  ;;  %v2315_v45 = vld [vmem:[#allocation8 + $0x344] sm:$0xf]  ;;  %1566 = vmatmul.msk.bf16.vlgmr.msra.gmra.mxu1 %vm151_vm0, %v120_v25  ;;  %985 = vmatpush.bf16.msra.mxu3 %v2018_v31  ;;  %v1734_v50 = vor.u32 %v2251_v42, %v1731_v44  ;;  %v2336_v44 = vld [vmem:[#allocation8 + $0x3e4] sm:$0xf0] }
  0x2b   :  { %v2319_v41 = vld [vmem:[#allocation8 + $0x35c] sm:$0xf0]  ;;  %v1987_v46 = vld [vmem:[#allocation8 + $0x360] sm:$0xf0] }
  0x2c   :  { %v1986_v47 = vor.u32 %v2319_v41, %v1985_v40  ;;  %v1697_v48 = vld [vmem:[#allocation8 + $0x100] sm:$0xf]  ;;  %998 = vmatpush.bf16.msrb.mxu0 %v1766_v35  ;;  %v1990_v53 = vor.u32 %v2315_v45, %v1987_v46  ;;  %v2243_v54 = vld [vmem:[#allocation8 + $0x104] sm:$0xf]  ;;  %973 = vmatpush.bf16.msra.mxu2 %v1730_v43  ;;  %v2272_v40 = vld [vmem:[#allocation8 + $0x1e4] sm:$0xf0] }
  0x2d   :  { %v2247_v49 = vld [vmem:[#allocation8 + $0x11c] sm:$0xf0]  ;;  %1011 = vmatpush.bf16.msrb.mxu1 %v2022_v39  ;;  %v1699_v55 = vld [vmem:[#allocation8 + $0x120] sm:$0xf0]  ;;  %v1801_v39 = vld [vmem:[#allocation8 + $0x1c8] sm:$0xf] }
  0x2e   :  { %v1953_v51 = vld [vmem:[#allocation8 + $0x300] sm:$0xf]  ;;  %v1698_v56 = vor.u32 %v2247_v49, %v1697_v48  ;;  %v2307_v57 = vld [vmem:[#allocation8 + $0x304] sm:$0xf]  ;;  %986 = vmatpush.bf16.msra.mxu3 %v1986_v47  ;;  %v1702_v62 = vor.u32 %v2243_v54, %v1699_v55  ;;  %v2057_v43 = vld [vmem:[#allocation8 + $0x3c8] sm:$0xf] }
  0x2f   :  { %v2311_v52 = vld [vmem:[#allocation8 + $0x31c] sm:$0xf0]  ;;  %v1955_v58 = vld [vmem:[#allocation8 + $0x320] sm:$0xf0]  ;;  %v2268_v47 = vld [vmem:[#allocation8 + $0x1cc] sm:$0xf]  ;;  %v2058_v54 = vor.u32 %v2336_v44, %v2057_v43 }
  0x30   :  { %v1954_v59 = vor.u32 %v2311_v52, %v1953_v51  ;;  %v1665_v60 = vld [vmem:[#allocation8 + $0xc0] sm:$0xf]  ;;  %999 = vmatpush.bf16.msrb.mxu0 %v1734_v50  ;;  %v1958_v1 = vor.u32 %v2307_v57, %v1955_v58  ;;  %v2235_v2 = vld [vmem:[#allocation8 + $0xc4] sm:$0xf]  ;;  %974 = vmatpush.bf16.msra.mxu2 %v1698_v56  ;;  %v1803_v48 = vld [vmem:[#allocation8 + $0x1e8] sm:$0xf0]  ;;  %v1802_v50 = vor.u32 %v2272_v40, %v1801_v39 }
  0x31   :  { %v2239_v61 = vld [vmem:[#allocation8 + $0xdc] sm:$0xf0]  ;;  %1012 = vmatpush.bf16.msrb.mxu1 %v1990_v53  ;;  %v1667_v3 = vld [vmem:[#allocation8 + $0xe0] sm:$0xf0]  ;;  %v2332_v51 = vld [vmem:[#allocation8 + $0x3cc] sm:$0xf]  ;;  %v1806_v58 = vor.u32 %v2268_v47, %v1803_v48 }
  0x32   :  { %v1921_v63 = vld [vmem:[#allocation8 + $0x2c0] sm:$0xf]  ;;  %v1666_v4 = vor.u32 %v2239_v61, %v1665_v60  ;;  %v2299_v5 = vld [vmem:[#allocation8 + $0x2c4] sm:$0xf]  ;;  %987 = vmatpush.bf16.msra.mxu3 %v1954_v59  ;;  %v1670_v10 = vor.u32 %v2235_v2, %v1667_v3  ;;  %v2059_v52 = vld [vmem:[#allocation8 + $0x3e8] sm:$0xf0] }
  0x33   :  { %v2303_v0 = vld [vmem:[#allocation8 + $0x2dc] sm:$0xf0]  ;;  %v1923_v6 = vld [vmem:[#allocation8 + $0x2e0] sm:$0xf0]  ;;  %v1769_v55 = vld [vmem:[#allocation8 + $0x188] sm:$0xf]  ;;  %v2062_v61 = vor.u32 %v2332_v51, %v2059_v52 }
  0x34   :  { %v1922_v7 = vor.u32 %v2303_v0, %v1921_v63  ;;  %v1633_v8 = vld [vmem:[#allocation8 + $0x80] sm:$0xf]  ;;  %1000 = vmatpush.bf16.msrb.mxu0 %v1702_v62  ;;  %v1926_v13 = vor.u32 %v2299_v5, %v1923_v6  ;;  %v2227_v14 = vld [vmem:[#allocation8 + $0x84] sm:$0xf]  ;;  %975 = vmatpush.bf16.msra.mxu2 %v1666_v4  ;;  %v2264_v56 = vld [vmem:[#allocation8 + $0x1a4] sm:$0xf0] }
  0x35   :  { %v2231_v9 = vld [vmem:[#allocation8 + $0x9c] sm:$0xf0]  ;;  %1013 = vmatpush.bf16.msrb.mxu1 %v1958_v1  ;;  %v1635_v15 = vld [vmem:[#allocation8 + $0xa0] sm:$0xf0]  ;;  %v2025_v59 = vld [vmem:[#allocation8 + $0x388] sm:$0xf]  ;;  %v1770_v0 = vor.u32 %v2264_v56, %v1769_v55 }
  0x36   :  { %v1889_v11 = vld [vmem:[#allocation8 + $0x280] sm:$0xf]  ;;  %v1634_v16 = vor.u32 %v2231_v9, %v1633_v8  ;;  %v2291_v17 = vld [vmem:[#allocation8 + $0x284] sm:$0xf]  ;;  %988 = vmatpush.bf16.msra.mxu3 %v1922_v7  ;;  %v1638_v22 = vor.u32 %v2227_v14, %v1635_v15  ;;  %v2328_v60 = vld [vmem:[#allocation8 + $0x3a4] sm:$0xf0] }
  0x37   :  { %v2295_v12 = vld [vmem:[#allocation8 + $0x29c] sm:$0xf0]  ;;  %v1891_v18 = vld [vmem:[#allocation8 + $0x2a0] sm:$0xf0]  ;;  %v2260_v62 = vld [vmem:[#allocation8 + $0x18c] sm:$0xf]  ;;  %v2026_v3 = vor.u32 %v2328_v60, %v2025_v59 }
  0x38   :  { %v1890_v19 = vor.u32 %v2295_v12, %v1889_v11  ;;  %v1601_v20 = vld [vmem:[#allocation8 + $0x40] sm:$0xf]  ;;  %1001 = vmatpush.bf16.msrb.mxu0 %v1670_v10  ;;  %v1894_v25 = vor.u32 %v2291_v17, %v1891_v18  ;;  %v2219_v26 = vld [vmem:[#allocation8 + $0x44] sm:$0xf]  ;;  %976 = vmatpush.bf16.msra.mxu2 %v1634_v16  ;;  %v1771_v63 = vld [vmem:[#allocation8 + $0x1a8] sm:$0xf0] }
  0x39   :  { %v2223_v21 = vld [vmem:[#allocation8 + $0x5c] sm:$0xf0]  ;;  %1014 = vmatpush.bf16.msrb.mxu1 %v1926_v13  ;;  %v1603_v27 = vld [vmem:[#allocation8 + $0x60] sm:$0xf0]  ;;  %v2324_v1 = vld [vmem:[#allocation8 + $0x38c] sm:$0xf]  ;;  %v1774_v6 = vor.u32 %v2260_v62, %v1771_v63 }
  0x3a   :  { %v1857_v23 = vld [vmem:[#allocation8 + $0x240] sm:$0xf]  ;;  %v2283_v28 = vld [vmem:[#allocation8 + $0x244] sm:$0xf]  ;;  %v1602_v29 = vor.u32 %v2223_v21, %v1601_v20  ;;  %989 = vmatpush.bf16.msra.mxu3 %v1890_v19  ;;  %v1606_v37 = vor.u32 %v2219_v26, %v1603_v27  ;;  %v2027_v2 = vld [vmem:[#allocation8 + $0x3a8] sm:$0xf0] }
  0x3b   :  { %v2287_v24 = vld [vmem:[#allocation8 + $0x25c] sm:$0xf0]  ;;  %v1859_v30 = vld [vmem:[#allocation8 + $0x260] sm:$0xf0]  ;;  %v1737_v4 = vld [vmem:[#allocation8 + $0x148] sm:$0xf]  ;;  %v2030_v9 = vor.u32 %v2324_v1, %v2027_v2 }
  0x3c   :  { %v1569_v31 = vld [vmem:[#allocation8] sm:$0xf]  ;;  %v1858_v33 = vor.u32 %v2287_v24, %v1857_v23  ;;  %v2211_v36 = vld [vmem:[#allocation8 + $0x4] sm:$0xf]  ;;  %1002 = vmatpush.bf16.msrb.mxu0 %v1638_v22  ;;  %v1862_v41 = vor.u32 %v2283_v28, %v1859_v30  ;;  %977 = vmatpush.bf16.msra.mxu2 %v1602_v29  ;;  %v2256_v5 = vld [vmem:[#allocation8 + $0x164] sm:$0xf0] }
  0x3d   :  { %v2215_v32 = vld [vmem:[#allocation8 + $0x1c] sm:$0xf0]  ;;  %v1571_v38 = vld [vmem:[#allocation8 + $0x20] sm:$0xf0]  ;;  %1015 = vmatpush.bf16.msrb.mxu1 %v1894_v25  ;;  %v1993_v7 = vld [vmem:[#allocation8 + $0x348] sm:$0xf]  ;;  %v1738_v12 = vor.u32 %v2256_v5, %v1737_v4 }
  0x3e   :  { %v1825_v34 = vld [vmem:[#allocation8 + $0x200] sm:$0xf]  ;;  %v2275_v42 = vld [vmem:[#allocation8 + $0x204] sm:$0xf]  ;;  %v1570_v45 = vor.u32 %v2215_v32, %v1569_v31  ;;  %990 = vmatpush.bf16.msra.mxu3 %v1858_v33  ;;  %v1574_v53 = vor.u32 %v2211_v36, %v1571_v38  ;;  %v2320_v8 = vld [vmem:[#allocation8 + $0x364] sm:$0xf0] }
  0x3f   :  { %v2279_v35 = vld [vmem:[#allocation8 + $0x21c] sm:$0xf0]  ;;  %v1827_v46 = vld [vmem:[#allocation8 + $0x220] sm:$0xf0]  ;;  %v2252_v10 = vld [vmem:[#allocation8 + $0x14c] sm:$0xf]  ;;  %v1994_v15 = vor.u32 %v2320_v8, %v1993_v7 }
  0x40   :  { %v1826_v49 = vor.u32 %v2279_v35, %v1825_v34  ;;  %1003 = vmatpush.bf16.msrb.mxu0 %v1606_v37  ;;  %v1830_v57 = vor.u32 %v2275_v42, %v1827_v46  ;;  %978 = vmatpush.bf16.msra.mxu2 %v1570_v45  ;;  %v1739_v11 = vld [vmem:[#allocation8 + $0x168] sm:$0xf0]  ;;  %v1705_v16 = vld [vmem:[#allocation8 + $0x108] sm:$0xf] }
  0x41   :  { %1016 = vmatpush.bf16.msrb.mxu1 %v1862_v41  ;;  %v2316_v13 = vld [vmem:[#allocation8 + $0x34c] sm:$0xf]  ;;  %v2248_v17 = vld [vmem:[#allocation8 + $0x124] sm:$0xf0]  ;;  %v1742_v18 = vor.u32 %v2252_v10, %v1739_v11 }
  0x42   :  { %991 = vmatpush.bf16.msra.mxu3 %v1826_v49  ;;  %v1995_v14 = vld [vmem:[#allocation8 + $0x368] sm:$0xf0]  ;;  %v1961_v19 = vld [vmem:[#allocation8 + $0x308] sm:$0xf]  ;;  %v1706_v24 = vor.u32 %v2248_v17, %v1705_v16 }
  0x43   :  { %v2312_v20 = vld [vmem:[#allocation8 + $0x324] sm:$0xf0]  ;;  %v1998_v21 = vor.u32 %v2316_v13, %v1995_v14  ;;  %v2244_v22 = vld [vmem:[#allocation8 + $0x10c] sm:$0xf]  ;;  %v125_v14 = vld [vmem:[#allocation7] sm:$0x3] }
  0x44   :  { %1023 = vmatpush.bf16.msrb.mxu2 %v1802_v50  ;;  %1004 = vmatpush.bf16.msrb.mxu0 %v1574_v53  ;;  %v1707_v23 = vld [vmem:[#allocation8 + $0x128] sm:$0xf0]  ;;  %v1962_v27 = vor.u32 %v2312_v20, %v1961_v19  ;;  %v1673_v28 = vld [vmem:[#allocation8 + $0xc8] sm:$0xf]  ;;  %v128_v16 = vperm.slane %v125_v14, 1 }
  0x45   :  { %1017 = vmatpush.bf16.msrb.mxu1 %v1830_v57  ;;  %v2308_v25 = vld [vmem:[#allocation8 + $0x30c] sm:$0xf]  ;;  %v2240_v29 = vld [vmem:[#allocation8 + $0xe4] sm:$0xf0]  ;;  %v1710_v30 = vor.u32 %v2244_v22, %v1707_v23  ;;  %v1809_v20 = vld [vmem:[#allocation8 + $0x1d0] sm:$0xf] }
  0x46   :  { %1036 = vmatpush.bf16.msrb.mxu3 %v2058_v54  ;;  %v1963_v26 = vld [vmem:[#allocation8 + $0x328] sm:$0xf0]  ;;  %v1929_v31 = vld [vmem:[#allocation8 + $0x2c8] sm:$0xf]  ;;  %v1674_v36 = vor.u32 %v2240_v29, %v1673_v28  ;;  %v2065_v22 = vld [vmem:[#allocation8 + $0x3d0] sm:$0xf] }
  0x47   :  { %v2304_v32 = vld [vmem:[#allocation8 + $0x2e4] sm:$0xf0]  ;;  %v1966_v33 = vor.u32 %v2308_v25, %v1963_v26  ;;  %v2236_v34 = vld [vmem:[#allocation8 + $0xcc] sm:$0xf]  ;;  %v2269_v25 = vld [vmem:[#allocation8 + $0x1d4] sm:$0xf] }
  0x48   :  { %1049 = vmatpush.bf16.msra.mxu0 %v1806_v58  ;;  %1024 = vmatpush.bf16.msrb.mxu2 %v1770_v0  ;;  %v1675_v35 = vld [vmem:[#allocation8 + $0xe8] sm:$0xf0]  ;;  %v1930_v39 = vor.u32 %v2304_v32, %v1929_v31  ;;  %v1641_v40 = vld [vmem:[#allocation8 + $0x88] sm:$0xf]  ;;  %v1811_v26 = vld [vmem:[#allocation8 + $0x1f0] sm:$0xf0] }
  0x49   :  { %1062 = vmatpush.bf16.msra.mxu1 %v2062_v61  ;;  %v2300_v37 = vld [vmem:[#allocation8 + $0x2cc] sm:$0xf]  ;;  %v2232_v41 = vld [vmem:[#allocation8 + $0xa4] sm:$0xf0]  ;;  %v1678_v42 = vor.u32 %v2236_v34, %v1675_v35  ;;  %v2333_v28 = vld [vmem:[#allocation8 + $0x3d4] sm:$0xf] }
  0x4a   :  { %1037 = vmatpush.bf16.msrb.mxu3 %v2026_v3  ;;  %v1931_v38 = vld [vmem:[#allocation8 + $0x2e8] sm:$0xf0]  ;;  %v1897_v43 = vld [vmem:[#allocation8 + $0x288] sm:$0xf]  ;;  %v1642_v48 = vor.u32 %v2232_v41, %v1641_v40  ;;  %v2067_v29 = vld [vmem:[#allocation8 + $0x3f0] sm:$0xf0] }
  0x4b   :  { %v2296_v44 = vld [vmem:[#allocation8 + $0x2a4] sm:$0xf0]  ;;  %v1934_v45 = vor.u32 %v2300_v37, %v1931_v38  ;;  %v2228_v46 = vld [vmem:[#allocation8 + $0x8c] sm:$0xf]  ;;  %v1777_v34 = vld [vmem:[#allocation8 + $0x190] sm:$0xf]  ;;  %v1814_v37 = vor.u32 %v2269_v25, %v1811_v26  ;;  %v2070_v38 = vor.u32 %v2333_v28, %v2067_v29 }
  0x4c   :  { %1050 = vmatpush.bf16.msra.mxu0 %v1774_v6  ;;  %1025 = vmatpush.bf16.msrb.mxu2 %v1738_v12  ;;  %v1643_v47 = vld [vmem:[#allocation8 + $0xa8] sm:$0xf0]  ;;  %v1898_v51 = vor.u32 %v2296_v44, %v1897_v43  ;;  %v1609_v54 = vld [vmem:[#allocation8 + $0x48] sm:$0xf]  ;;  %v2265_v35 = vld [vmem:[#allocation8 + $0x1ac] sm:$0xf0] }
  0x4d   :  { %1063 = vmatpush.bf16.msra.mxu1 %v2030_v9  ;;  %v2292_v49 = vld [vmem:[#allocation8 + $0x28c] sm:$0xf]  ;;  %v1646_v52 = vor.u32 %v2228_v46, %v1643_v47  ;;  %v2224_v55 = vld [vmem:[#allocation8 + $0x64] sm:$0xf0]  ;;  %v2329_v40 = vld [vmem:[#allocation8 + $0x3ac] sm:$0xf0]  ;;  %v1778_v47 = vor.u32 %v2265_v35, %v1777_v34 }
  0x4e   :  { %1038 = vmatpush.bf16.msrb.mxu3 %v1994_v15  ;;  %v1899_v50 = vld [vmem:[#allocation8 + $0x2a8] sm:$0xf0]  ;;  %v1610_v56 = vor.u32 %v2224_v55, %v1609_v54  ;;  %v1865_v57 = vld [vmem:[#allocation8 + $0x248] sm:$0xf]  ;;  %v127_v15 = vperm.slane %v125_v14, 0 }
  0x4f   :  { %v1902_v53 = vor.u32 %v2292_v49, %v1899_v50  ;;  %v2288_v58 = vld [vmem:[#allocation8 + $0x264] sm:$0xf0]  ;;  %v2220_v59 = vld [vmem:[#allocation8 + $0x4c] sm:$0xf]  ;;  %v2261_v41 = vld [vmem:[#allocation8 + $0x194] sm:$0xf] }
  0x50   :  { %1051 = vmatpush.bf16.msra.mxu0 %v1742_v18  ;;  %1026 = vmatpush.bf16.msrb.mxu2 %v1706_v24  ;;  %v1866_v60 = vor.u32 %v2288_v58, %v1865_v57  ;;  %v1611_v61 = vld [vmem:[#allocation8 + $0x68] sm:$0xf0]  ;;  %v1577_v2 = vld [vmem:[#allocation8 + $0x8] sm:$0xf]  ;;  %v2337_v24 = vld [vmem:[#allocation8 + $0x3ec] sm:$0xf0] }
  0x51   :  { %1064 = vmatpush.bf16.msra.mxu1 %v1998_v21  ;;  %v2284_v62 = vld [vmem:[#allocation8 + $0x24c] sm:$0xf]  ;;  %v1614_v0 = vor.u32 %v2220_v59, %v1611_v61  ;;  %v2216_v3 = vld [vmem:[#allocation8 + $0x24] sm:$0xf0]  ;;  %v2273_v21 = vld [vmem:[#allocation8 + $0x1ec] sm:$0xf0] }
  0x52   :  { %1039 = vmatpush.bf16.msrb.mxu3 %v1962_v27  ;;  %v1867_v63 = vld [vmem:[#allocation8 + $0x268] sm:$0xf0]  ;;  %v1833_v4 = vld [vmem:[#allocation8 + $0x208] sm:$0xf]  ;;  %v1578_v5 = vor.u32 %v2216_v3, %v1577_v2  ;;  %v1810_v32 = vor.u32 %v2273_v21, %v1809_v20  ;;  %v2325_v43 = vld [vmem:[#allocation8 + $0x394] sm:$0xf] }
  0x53   :  { %v1870_v1 = vor.u32 %v2284_v62, %v1867_v63  ;;  %v2280_v6 = vld [vmem:[#allocation8 + $0x224] sm:$0xf0]  ;;  %v2212_v7 = vld [vmem:[#allocation8 + $0xc] sm:$0xf]  ;;  %v2035_v44 = vld [vmem:[#allocation8 + $0x3b0] sm:$0xf0] }
  0x54   :  { %1052 = vmatpush.bf16.msra.mxu0 %v1710_v30  ;;  %1027 = vmatpush.bf16.msrb.mxu2 %v1674_v36  ;;  %v1579_v8 = vld [vmem:[#allocation8 + $0x28] sm:$0xf0]  ;;  %v1834_v9 = vor.u32 %v2280_v6, %v1833_v4  ;;  %v1745_v49 = vld [vmem:[#allocation8 + $0x150] sm:$0xf]  ;;  %v2253_v55 = vld [vmem:[#allocation8 + $0x154] sm:$0xf] }
  0x55   :  { %1065 = vmatpush.bf16.msra.mxu1 %v1966_v33  ;;  %v1582_v10 = vor.u32 %v2212_v7, %v1579_v8  ;;  %v2276_v11 = vld [vmem:[#allocation8 + $0x20c] sm:$0xf]  ;;  %v2066_v33 = vor.u32 %v2337_v24, %v2065_v22  ;;  %v2257_v50 = vld [vmem:[#allocation8 + $0x16c] sm:$0xf0]  ;;  %v2317_v57 = vld [vmem:[#allocation8 + $0x354] sm:$0xf] }
  0x56   :  { %1040 = vmatpush.bf16.msrb.mxu3 %v1930_v39  ;;  %v1835_v12 = vld [vmem:[#allocation8 + $0x228] sm:$0xf0]  ;;  %v2033_v39 = vld [vmem:[#allocation8 + $0x390] sm:$0xf]  ;;  %v2003_v58 = vld [vmem:[#allocation8 + $0x370] sm:$0xf0]  ;;  %v1746_v59 = vor.u32 %v2257_v50, %v1745_v49 }
  0x57   :  { %v1838_v13 = vor.u32 %v2276_v11, %v1835_v12  ;;  %v2321_v54 = vld [vmem:[#allocation8 + $0x36c] sm:$0xf0]  ;;  %v2245_v3 = vld [vmem:[#allocation8 + $0x114] sm:$0xf] }
  0x58   :  { %1053 = vmatpush.bf16.msra.mxu0 %v1678_v42  ;;  %1028 = vmatpush.bf16.msrb.mxu2 %v1642_v48  ;;  %v1779_v42 = vld [vmem:[#allocation8 + $0x1b0] sm:$0xf0]  ;;  %v2034_v48 = vor.u32 %v2329_v40, %v2033_v39  ;;  %v1713_v61 = vld [vmem:[#allocation8 + $0x110] sm:$0xf] }
  0x59   :  { %1066 = vmatpush.bf16.msra.mxu1 %v1934_v45  ;;  %v2249_v62 = vld [vmem:[#allocation8 + $0x12c] sm:$0xf0]  ;;  %v1715_v4 = vld [vmem:[#allocation8 + $0x130] sm:$0xf0] }
  0x5a   :  { %1041 = vmatpush.bf16.msrb.mxu3 %v1898_v51  ;;  %v1782_v51 = vor.u32 %v2261_v41, %v1779_v42  ;;  %v2313_v2 = vld [vmem:[#allocation8 + $0x32c] sm:$0xf0]  ;;  %v1971_v6 = vld [vmem:[#allocation8 + $0x330] sm:$0xf0]  ;;  %v1714_v7 = vor.u32 %v2249_v62, %v1713_v61  ;;  %v1718_v11 = vor.u32 %v2245_v3, %v1715_v4  ;;  %v2270_v61 = vld [vmem:[#allocation8 + $0x1dc] sm:$0xf] }
  0x5b   :  { %v2305_v14 = vld [vmem:[#allocation8 + $0x2ec] sm:$0xf0]  ;;  %v1651_v28 = vld [vmem:[#allocation8 + $0xb0] sm:$0xf0] }
  0x5c   :  { %1054 = vmatpush.bf16.msra.mxu0 %v1646_v52  ;;  %1029 = vmatpush.bf16.msrb.mxu2 %v1610_v56  ;;  %v2038_v52 = vor.u32 %v2325_v43, %v2035_v44  ;;  %v1747_v56 = vld [vmem:[#allocation8 + $0x170] sm:$0xf0]  ;;  %v1649_v21 = vld [vmem:[#allocation8 + $0x90] sm:$0xf] }
  0x5d   :  { %1067 = vmatpush.bf16.msra.mxu1 %v1902_v53  ;;  %v2001_v53 = vld [vmem:[#allocation8 + $0x350] sm:$0xf]  ;;  %v1750_v63 = vor.u32 %v2253_v55, %v1747_v56  ;;  %v2293_v29 = vld [vmem:[#allocation8 + $0x294] sm:$0xf] }
  0x5e   :  { %1042 = vmatpush.bf16.msrb.mxu3 %v1866_v60  ;;  %v2002_v60 = vor.u32 %v2321_v54, %v2001_v53  ;;  %v2233_v22 = vld [vmem:[#allocation8 + $0xac] sm:$0xf0]  ;;  %v2221_v41 = vld [vmem:[#allocation8 + $0x54] sm:$0xf] }
  0x5f   :  { %v1905_v25 = vld [vmem:[#allocation8 + $0x290] sm:$0xf]  ;;  %v1619_v42 = vld [vmem:[#allocation8 + $0x70] sm:$0xf0] }
  0x60   :  { %1055 = vmatpush.bf16.msra.mxu0 %v1614_v0  ;;  %1030 = vmatpush.bf16.msrb.mxu2 %v1578_v5  ;;  %v2006_v0 = vor.u32 %v2317_v57, %v2003_v58  ;;  %v2309_v5 = vld [vmem:[#allocation8 + $0x314] sm:$0xf]  ;;  %v2297_v26 = vld [vmem:[#allocation8 + $0x2ac] sm:$0xf0]  ;;  %v1817_v57 = vld [vmem:[#allocation8 + $0x1d8] sm:$0xf] }
  0x61   :  { %1068 = vmatpush.bf16.msra.mxu1 %v1870_v1  ;;  %v1969_v1 = vld [vmem:[#allocation8 + $0x310] sm:$0xf]  ;;  %v1974_v12 = vor.u32 %v2309_v5, %v1971_v6  ;;  %v2285_v43 = vld [vmem:[#allocation8 + $0x254] sm:$0xf]  ;;  %v2274_v58 = vld [vmem:[#allocation8 + $0x1f4] sm:$0xf0] }
  0x62   :  { %1043 = vmatpush.bf16.msrb.mxu3 %v1834_v9  ;;  %v1970_v8 = vor.u32 %v2313_v2, %v1969_v1  ;;  %v1681_v9 = vld [vmem:[#allocation8 + $0xd0] sm:$0xf]  ;;  %v1875_v44 = vld [vmem:[#allocation8 + $0x270] sm:$0xf0]  ;;  %v2334_v1 = vld [vmem:[#allocation8 + $0x3dc] sm:$0xf]  ;;  %v1818_v5 = vor.u32 %v2274_v58, %v1817_v57 }
  0x63   :  { %v1617_v34 = vld [vmem:[#allocation8 + $0x50] sm:$0xf]  ;;  %v2213_v53 = vld [vmem:[#allocation8 + $0x14] sm:$0xf]  ;;  %v2075_v2 = vld [vmem:[#allocation8 + $0x3f8] sm:$0xf0] }
  0x64   :  { %1056 = vmatpush.bf16.msra.mxu0 %v1582_v10  ;;  %v2241_v10 = vld [vmem:[#allocation8 + $0xec] sm:$0xf0]  ;;  %v1587_v54 = vld [vmem:[#allocation8 + $0x30] sm:$0xf0]  ;;  %v1657_v57 = vld [vmem:[#allocation8 + $0x98] sm:$0xf] }
  0x65   :  { %1069 = vmatpush.bf16.msra.mxu1 %v1838_v13  ;;  %v1937_v13 = vld [vmem:[#allocation8 + $0x2d0] sm:$0xf]  ;;  %v2277_v55 = vld [vmem:[#allocation8 + $0x214] sm:$0xf]  ;;  %v1590_v3 = vor.u32 %v2213_v53, %v1587_v54  ;;  %v2302_v53 = vld [vmem:[#allocation8 + $0x2dc] sm:$0xf] }
  0x66   :  { %v1938_v20 = vor.u32 %v2305_v14, %v1937_v13  ;;  %v2225_v35 = vld [vmem:[#allocation8 + $0x6c] sm:$0xf0]  ;;  %v1843_v56 = vld [vmem:[#allocation8 + $0x230] sm:$0xf0]  ;;  %v2262_v13 = vld [vmem:[#allocation8 + $0x19c] sm:$0xf] }
  0x67   :  { %v1873_v39 = vld [vmem:[#allocation8 + $0x250] sm:$0xf]  ;;  %v1846_v4 = vor.u32 %v2277_v55, %v1843_v56  ;;  %v1787_v14 = vld [vmem:[#allocation8 + $0x1b8] sm:$0xf0]  ;;  %v2234_v58 = vld [vmem:[#allocation8 + $0xb4] sm:$0xf0] }
  0x68   :  { %v2289_v40 = vld [vmem:[#allocation8 + $0x26c] sm:$0xf0]  ;;  %v1947_v54 = vld [vmem:[#allocation8 + $0x2f8] sm:$0xf0] }
  0x69   :  { %v1841_v49 = vld [vmem:[#allocation8 + $0x210] sm:$0xf] }
  0x6a   :  { %v2281_v50 = vld [vmem:[#allocation8 + $0x22c] sm:$0xf0] }
  0xa4   :  { %v164_v17 = vpop.f32.mrf.mxu0 }
  0xa5   :  { %v165_v18 = vadd.f32 %v164_v17, %v127_v15  ;;  %v2237_v15 = vld [vmem:[#allocation8 + $0xd4] sm:$0xf] }
  0xa6   :  { %v2301_v17 = vld [vmem:[#allocation8 + $0x2d4] sm:$0xf] }
  0xa7   :  { %v177_v19 = vpop.f32.mrf.mxu1  ;;  %v181_v27 = vmax.f32 %v165_v18, 0.0  ;;  %v1939_v18 = vld [vmem:[#allocation8 + $0x2f0] sm:$0xf0] }
  0xa8   :  { %v178_v23 = vadd.f32 %v177_v19, %v128_v16  ;;  %v1683_v16 = vld [vmem:[#allocation8 + $0xf0] sm:$0xf0]  ;;  %v1682_v19 = vor.u32 %v2241_v10, %v1681_v9  ;;  %v1942_v24 = vor.u32 %v2301_v17, %v1939_v18  ;;  %v2078_v10 = vor.u32 %v2334_v1, %v2075_v2  ;;  %v2294_v1 = vld [vmem:[#allocation8 + $0x29c] sm:$0xf] }
  0xa9   :  { %v2641_v31 = vpack.c.bf16 %v181_v27, %v181_v27  ;;  %v2229_v27 = vld [vmem:[#allocation8 + $0x94] sm:$0xf]  ;;  %v1915_v2 = vld [vmem:[#allocation8 + $0x2b8] sm:$0xf0] }
  0xaa   :  { %v182_v30 = vmax.f32 %v178_v23, 0.0  ;;  %v1686_v23 = vor.u32 %v2237_v15, %v1683_v16  ;;  %v2326_v15 = vld [vmem:[#allocation8 + $0x39c] sm:$0xf] }
  0xab   :  { %979 = vmatmul.bf16.vlgmr.msra.gmra.mxu2 %v2641_v31  ;;  %1005 = vmatmul.bf16.vlgmr.msrb.gmra.mxu0 %v2641_v31  ;;  %v2043_v16 = vld [vmem:[#allocation8 + $0x3b8] sm:$0xf0] }
  0xac   :  { %v2643_v36 = vpack.c.bf16 %v182_v30, %v182_v30  ;;  %v166_v45 = vpop.f32.mrf.mxu0  ;;  %1075 = vmatpush.bf16.msra.mxu2 %v1810_v32  ;;  %1101 = vmatpush.bf16.msrb.mxu0 %v1814_v37  ;;  %v1907_v30 = vld [vmem:[#allocation8 + $0x2b0] sm:$0xf0]  ;;  %v1650_v32 = vor.u32 %v2233_v22, %v1649_v21  ;;  %v1654_v37 = vor.u32 %v2229_v27, %v1651_v28  ;;  %v2318_v27 = vld [vmem:[#allocation8 + $0x35c] sm:$0xf] }
  0xad   :  { %v1585_v45 = vld [vmem:[#allocation8 + $0x10] sm:$0xf]  ;;  %v1790_v21 = vor.u32 %v2262_v13, %v1787_v14  ;;  %v2046_v22 = vor.u32 %v2326_v15, %v2043_v16  ;;  %v2011_v28 = vld [vmem:[#allocation8 + $0x378] sm:$0xf0] }
  0xae   :  { %992 = vmatmul.bf16.vlgmr.msra.gmra.mxu3 %v2643_v36  ;;  %1018 = vmatmul.bf16.vlgmr.msrb.gmra.mxu1 %v2643_v36  ;;  %v2286_v13 = vld [vmem:[#allocation8 + $0x25c] sm:$0xf] }
  0xaf   :  { %1088 = vmatpush.bf16.msra.mxu3 %v2066_v33  ;;  %v179_v46 = vpop.f32.mrf.mxu1  ;;  %1114 = vmatpush.bf16.msrb.mxu1 %v2070_v38  ;;  %v1906_v33 = vor.u32 %v2297_v26, %v1905_v25  ;;  %v1910_v38 = vor.u32 %v2293_v29, %v1907_v30  ;;  %v2254_v25 = vld [vmem:[#allocation8 + $0x15c] sm:$0xf] }
  0xb0   :  { %1076 = vmatpush.bf16.msra.mxu2 %v1778_v47  ;;  %1102 = vmatpush.bf16.msrb.mxu0 %v1782_v51  ;;  %v1618_v46 = vor.u32 %v2225_v35, %v1617_v34  ;;  %v1874_v47 = vor.u32 %v2289_v40, %v1873_v39  ;;  %v1622_v51 = vor.u32 %v2221_v41, %v1619_v42  ;;  %v1755_v26 = vld [vmem:[#allocation8 + $0x178] sm:$0xf0] }
  0xb1   :  { %v1758_v34 = vor.u32 %v2254_v25, %v1755_v26  ;;  %v2014_v35 = vor.u32 %v2318_v27, %v2011_v28  ;;  %v2246_v39 = vld [vmem:[#allocation8 + $0x11c] sm:$0xf] }
  0xb2   :  { %v1723_v40 = vld [vmem:[#allocation8 + $0x138] sm:$0xf0] }
  0xb3   :  { %1089 = vmatpush.bf16.msra.mxu3 %v2034_v48  ;;  %1115 = vmatpush.bf16.msrb.mxu1 %v2038_v52  ;;  %v2217_v48 = vld [vmem:[#allocation8 + $0x2c] sm:$0xf0]  ;;  %v1878_v52 = vor.u32 %v2285_v43, %v1875_v44  ;;  %v2310_v41 = vld [vmem:[#allocation8 + $0x31c] sm:$0xf] }
  0xb4   :  { %1077 = vmatpush.bf16.msra.mxu2 %v1746_v59  ;;  %1103 = vmatpush.bf16.msrb.mxu0 %v1750_v63  ;;  %v2073_v59 = vld [vmem:[#allocation8 + $0x3d8] sm:$0xf]  ;;  %v1586_v62 = vor.u32 %v2217_v48, %v1585_v45  ;;  %v1842_v63 = vor.u32 %v2281_v50, %v1841_v49  ;;  %v1979_v42 = vld [vmem:[#allocation8 + $0x338] sm:$0xf0] }
  0xb5   :  { %v1689_v45 = vld [vmem:[#allocation8 + $0xd8] sm:$0xf]  ;;  %v1982_v48 = vor.u32 %v2310_v41, %v1979_v42  ;;  %v1883_v14 = vld [vmem:[#allocation8 + $0x278] sm:$0xf0]  ;;  %v2351_v41 = vld [vmem:[#allocation11 + $0x60] sm:$0xff] }
  0xb6   :  { %v1945_v49 = vld [vmem:[#allocation8 + $0x2d8] sm:$0xf]  ;;  %v2278_v25 = vld [vmem:[#allocation8 + $0x21c] sm:$0xf]  ;;  %v2343_v42 = vld [vmem:[#allocation11 + $0x20] sm:$0xff] }
  0xb7   :  { %1090 = vmatpush.bf16.msra.mxu3 %v2002_v60  ;;  %1116 = vmatpush.bf16.msrb.mxu1 %v2006_v0  ;;  %v2338_v60 = vld [vmem:[#allocation8 + $0x3f4] sm:$0xf0]  ;;  %v1819_v0 = vld [vmem:[#allocation8 + $0x1f8] sm:$0xf0] }
  0xb8   :  { %1078 = vmatpush.bf16.msra.mxu2 %v1714_v7  ;;  %1104 = vmatpush.bf16.msrb.mxu0 %v1718_v11  ;;  %v2074_v6 = vor.u32 %v2338_v60, %v2073_v59  ;;  %v1785_v7 = vld [vmem:[#allocation8 + $0x198] sm:$0xf]  ;;  %v1822_v9 = vor.u32 %v2270_v61, %v1819_v0  ;;  %v1950_v60 = vor.u32 %v2302_v53, %v1947_v54  ;;  %v1659_v0 = vld [vmem:[#allocation8 + $0xb8] sm:$0xf0]  ;;  %v2366_v53 = vld [vmem:[#allocation11 + $0xd8] sm:$0xff] }
  0xb9   :  { %v2041_v11 = vld [vmem:[#allocation8 + $0x398] sm:$0xf]  ;;  %v1851_v26 = vld [vmem:[#allocation8 + $0x238] sm:$0xf0]  ;;  %v2339_v54 = vld [vmem:[#allocation11] sm:$0xff] }
  0xba   :  { %v2306_v50 = vld [vmem:[#allocation8 + $0x2f4] sm:$0xf0] }
  0xbb   :  { %1091 = vmatpush.bf16.msra.mxu3 %v1970_v8  ;;  %1117 = vmatpush.bf16.msrb.mxu1 %v1974_v12  ;;  %v2266_v8 = vld [vmem:[#allocation8 + $0x1b4] sm:$0xf0]  ;;  %v1946_v56 = vor.u32 %v2306_v50, %v1945_v49  ;;  %v2347_v49 = vld [vmem:[#allocation11 + $0x40] sm:$0xff] }
  0xbc   :  { %1031 = vmatmul.bf16.vlgmr.msrb.gmra.mxu2 %v2641_v31  ;;  %1057 = vmatmul.bf16.vlgmr.msra.gmra.mxu0 %v2641_v31  ;;  %v2330_v12 = vld [vmem:[#allocation8 + $0x3b4] sm:$0xf0]  ;;  %v1786_v17 = vor.u32 %v2266_v8, %v1785_v7  ;;  %v1918_v8 = vor.u32 %v2294_v1, %v1915_v2  ;;  %v2367_v50 = vld [vmem:[#allocation11 + $0xe0] sm:$0xff] }
  0xbd   :  { %1079 = vmatpush.bf16.msra.mxu2 %v1682_v19  ;;  %1105 = vmatpush.bf16.msrb.mxu0 %v1686_v23  ;;  %v2042_v18 = vor.u32 %v2330_v12, %v2041_v11  ;;  %v1753_v19 = vld [vmem:[#allocation8 + $0x158] sm:$0xf]  ;;  %v2222_v11 = vld [vmem:[#allocation8 + $0x5c] sm:$0xf] }
  0xbe   :  { %1044 = vmatmul.bf16.vlgmr.msrb.gmra.mxu3 %v2643_v36  ;;  %1070 = vmatmul.bf16.vlgmr.msra.gmra.mxu1 %v2643_v36  ;;  %v2009_v23 = vld [vmem:[#allocation8 + $0x358] sm:$0xf]  ;;  %v1627_v12 = vld [vmem:[#allocation8 + $0x78] sm:$0xf0] }
  0xbf   :  { %1092 = vmatpush.bf16.msra.mxu3 %v1938_v20  ;;  %1118 = vmatpush.bf16.msrb.mxu1 %v1942_v24  ;;  %v2258_v20 = vld [vmem:[#allocation8 + $0x174] sm:$0xf0] }
  0xc0   :  { %v2322_v24 = vld [vmem:[#allocation8 + $0x374] sm:$0xf0]  ;;  %v1754_v29 = vor.u32 %v2258_v20, %v1753_v19  ;;  %v1630_v19 = vor.u32 %v2222_v11, %v1627_v12  ;;  %v1886_v20 = vor.u32 %v2286_v13, %v1883_v14 }
  0xc1   :  { %1080 = vmatpush.bf16.msra.mxu2 %v1650_v32  ;;  %1106 = vmatpush.bf16.msrb.mxu0 %v1654_v37  ;;  %v2010_v30 = vor.u32 %v2322_v24, %v2009_v23  ;;  %v1721_v32 = vld [vmem:[#allocation8 + $0x118] sm:$0xf]  ;;  %v2214_v23 = vld [vmem:[#allocation8 + $0x1c] sm:$0xf] }
  0xc2   :  { %v1977_v37 = vld [vmem:[#allocation8 + $0x318] sm:$0xf]  ;;  %v1595_v24 = vld [vmem:[#allocation8 + $0x38] sm:$0xf0] }
  0xc3   :  { %1093 = vmatpush.bf16.msra.mxu3 %v1906_v33  ;;  %1119 = vmatpush.bf16.msrb.mxu1 %v1910_v38  ;;  %v2250_v33 = vld [vmem:[#allocation8 + $0x134] sm:$0xf0] }
  0xc4   :  { %v2314_v38 = vld [vmem:[#allocation8 + $0x334] sm:$0xf0]  ;;  %v1722_v43 = vor.u32 %v2250_v33, %v1721_v32  ;;  %v2354_v32 = vld [vmem:[#allocation11 + $0x78] sm:$0xff] }
  0xc5   :  { %1081 = vmatpush.bf16.msra.mxu2 %v1618_v46  ;;  %1107 = vmatpush.bf16.msrb.mxu0 %v1622_v51  ;;  %v1978_v44 = vor.u32 %v2314_v38, %v1977_v37  ;;  %v2242_v46 = vld [vmem:[#allocation8 + $0xf4] sm:$0xf0]  ;;  %v2238_v51 = vld [vmem:[#allocation8 + $0xdc] sm:$0xf]  ;;  %v2346_v33 = vld [vmem:[#allocation11 + $0x38] sm:$0xff] }
  0xc6   :  { %v1690_v55 = vor.u32 %v2242_v46, %v1689_v45  ;;  %v1913_v61 = vld [vmem:[#allocation8 + $0x298] sm:$0xf]  ;;  %v2362_v45 = vld [vmem:[#allocation11 + $0xb8] sm:$0xff]  ;;  %v2368_v46 = vld [vmem:[#allocation11 + $0xe8] sm:$0xff] }
  0xc7   :  { %1094 = vmatpush.bf16.msra.mxu3 %v1874_v47  ;;  %1120 = vmatpush.bf16.msrb.mxu1 %v1878_v52  ;;  %v1726_v47 = vor.u32 %v2246_v39, %v1723_v40  ;;  %v1691_v52 = vld [vmem:[#allocation8 + $0xf8] sm:$0xf0]  ;;  %v2352_v39 = vld [vmem:[#allocation11 + $0x68] sm:$0xff] }
  0xc8   :  { %v1694_v59 = vor.u32 %v2238_v51, %v1691_v52  ;;  %v2345_v37 = vld [vmem:[#allocation11 + $0x30] sm:$0xff]  ;;  %v2344_v40 = vld [vmem:[#allocation11 + $0x28] sm:$0xff] }
  0xc9   :  { %1082 = vmatpush.bf16.msra.mxu2 %v1586_v62  ;;  %1108 = vmatpush.bf16.msrb.mxu0 %v1590_v3  ;;  %v2298_v62 = vld [vmem:[#allocation8 + $0x2b4] sm:$0xf0]  ;;  %v1658_v3 = vor.u32 %v2234_v58, %v1657_v57  ;;  %v2340_v51 = vld [vmem:[#allocation11 + $0x8] sm:$0xff]  ;;  %v2358_v57 = vld [vmem:[#allocation11 + $0x98] sm:$0xff] }
  0xca   :  { %v2369_v38 = vld [vmem:[#allocation11 + $0xf0] sm:$0xff]  ;;  %v2360_v52 = vld [vmem:[#allocation11 + $0xa8] sm:$0xff] }
  0xcb   :  { %1095 = vmatpush.bf16.msra.mxu3 %v1842_v63  ;;  %1121 = vmatpush.bf16.msrb.mxu1 %v1846_v4  ;;  %v2230_v63 = vld [vmem:[#allocation8 + $0x9c] sm:$0xf]  ;;  %v1914_v4 = vor.u32 %v2298_v62, %v1913_v61  ;;  %v2364_v58 = vld [vmem:[#allocation11 + $0xc8] sm:$0xff]  ;;  %v2661_v61 = vld [vmem:[#allocation10] sm:$0xff] }
  0xcc   :  { %1083 = vmatmul.bf16.vlgmr.msra.gmra.mxu2 %v2641_v31  ;;  %1109 = vmatmul.bf16.vlgmr.msrb.gmra.mxu0 %v2641_v31  ;;  %v1662_v7 = vor.u32 %v2230_v63, %v1659_v0  ;;  %v2356_v62 = vld [vmem:[#allocation11 + $0x88] sm:$0xff]  ;;  %v316_v63 = vperm.slane %v2661_v61, 1  ;;  %v2355_v0 = vld [vmem:[#allocation11 + $0x80] sm:$0xff] }
  0xcd   :  { %1127 = vmatpush.bf16.msrb.mxu2 %v1818_v5  ;;  %1153 = vmatpush.bf16.msra.mxu0 %v1822_v9  ;;  %v1625_v5 = vld [vmem:[#allocation8 + $0x58] sm:$0xf] }
  0xce   :  { %1096 = vmatmul.bf16.vlgmr.msra.gmra.mxu3 %v2643_v36  ;;  %1122 = vmatmul.bf16.vlgmr.msrb.gmra.mxu1 %v2643_v36  ;;  %v1881_v9 = vld [vmem:[#allocation8 + $0x258] sm:$0xf] }
  0xcf   :  { %1140 = vmatpush.bf16.msrb.mxu3 %v2074_v6  ;;  %1166 = vmatpush.bf16.msra.mxu1 %v2078_v10  ;;  %v2226_v6 = vld [vmem:[#allocation8 + $0x74] sm:$0xf0] }
  0xd0   :  { %v2290_v10 = vld [vmem:[#allocation8 + $0x274] sm:$0xf0]  ;;  %v1626_v15 = vor.u32 %v2226_v6, %v1625_v5  ;;  %v315_v5 = vperm.slane %v2661_v61, 0 }
  0xd1   :  { %1128 = vmatpush.bf16.msrb.mxu2 %v1786_v17  ;;  %1154 = vmatpush.bf16.msra.mxu0 %v1790_v21  ;;  %v1882_v16 = vor.u32 %v2290_v10, %v1881_v9  ;;  %v1593_v17 = vld [vmem:[#allocation8 + $0x18] sm:$0xf] }
  0xd2   :  { %v1849_v21 = vld [vmem:[#allocation8 + $0x218] sm:$0xf] }
  0xd3   :  { %1141 = vmatpush.bf16.msrb.mxu3 %v2042_v18  ;;  %1167 = vmatpush.bf16.msra.mxu1 %v2046_v22  ;;  %v2218_v18 = vld [vmem:[#allocation8 + $0x34] sm:$0xf0] }
  0xd4   :  { %v2282_v22 = vld [vmem:[#allocation8 + $0x234] sm:$0xf0]  ;;  %v1594_v27 = vor.u32 %v2218_v18, %v1593_v17 }
  0xd5   :  { %1129 = vmatpush.bf16.msrb.mxu2 %v1754_v29  ;;  %1155 = vmatpush.bf16.msra.mxu0 %v1758_v34  ;;  %v1850_v28 = vor.u32 %v2282_v22, %v1849_v21  ;;  %v1598_v29 = vor.u32 %v2214_v23, %v1595_v24  ;;  %v2370_v34 = vld [vmem:[#allocation11 + $0xf8] sm:$0xff]  ;;  %v317_v23 = vperm.slane %v2661_v61, 2 }
  0xd7   :  { %1142 = vmatpush.bf16.msrb.mxu3 %v2010_v30  ;;  %1168 = vmatpush.bf16.msra.mxu1 %v2014_v35  ;;  %v1854_v30 = vor.u32 %v2278_v25, %v1851_v26  ;;  %v2353_v35 = vld [vmem:[#allocation11 + $0x70] sm:$0xff] }
  0xd9   :  { %1130 = vmatpush.bf16.msrb.mxu2 %v1722_v43  ;;  %1156 = vmatpush.bf16.msra.mxu0 %v1726_v47  ;;  %v2350_v43 = vld [vmem:[#allocation11 + $0x58] sm:$0xff]  ;;  %v2341_v47 = vld [vmem:[#allocation11 + $0x10] sm:$0xff] }
  0xdb   :  { %1143 = vmatpush.bf16.msrb.mxu3 %v1978_v44  ;;  %1169 = vmatpush.bf16.msra.mxu1 %v1982_v48  ;;  %v2349_v44 = vld [vmem:[#allocation11 + $0x50] sm:$0xff] }
  0xdc   :  { %v2361_v48 = vld [vmem:[#allocation11 + $0xb0] sm:$0xff] }
  0xdd   :  { %1131 = vmatpush.bf16.msrb.mxu2 %v1690_v55  ;;  %1157 = vmatpush.bf16.msra.mxu0 %v1694_v59  ;;  %v2359_v55 = vld [vmem:[#allocation11 + $0xa0] sm:$0xff]  ;;  %v2357_v59 = vld [vmem:[#allocation11 + $0x90] sm:$0xff] }
  0xdf   :  { %1144 = vmatpush.bf16.msrb.mxu3 %v1946_v56  ;;  %1170 = vmatpush.bf16.msra.mxu1 %v1950_v60  ;;  %v2365_v56 = vld [vmem:[#allocation11 + $0xd0] sm:$0xff]  ;;  %v2363_v60 = vld [vmem:[#allocation11 + $0xc0] sm:$0xff] }
  0xe1   :  { %1132 = vmatpush.bf16.msrb.mxu2 %v1658_v3  ;;  %1158 = vmatpush.bf16.msra.mxu0 %v1662_v7 }
  0xe3   :  { %1145 = vmatpush.bf16.msrb.mxu3 %v1914_v4  ;;  %1171 = vmatpush.bf16.msra.mxu1 %v1918_v8 }
  0xe5   :  { %1133 = vmatpush.bf16.msrb.mxu2 %v1626_v15  ;;  %1159 = vmatpush.bf16.msra.mxu0 %v1630_v19 }
  0xe7   :  { %1146 = vmatpush.bf16.msrb.mxu3 %v1882_v16  ;;  %1172 = vmatpush.bf16.msra.mxu1 %v1886_v20  ;;  %v318_v16 = vperm.slane %v2661_v61, 3 }
  0xe9   :  { %1134 = vmatpush.bf16.msrb.mxu2 %v1594_v27  ;;  %1160 = vmatpush.bf16.msra.mxu0 %v1598_v29 }
  0xeb   :  { %1147 = vmatpush.bf16.msrb.mxu3 %v1850_v28  ;;  %1173 = vmatpush.bf16.msra.mxu1 %v1854_v30 }
  0xec   :  { %1135 = vmatmul.bf16.vlgmr.msrb.gmra.mxu2 %v2641_v31  ;;  %1161 = vmatmul.bf16.vlgmr.msra.gmra.mxu0 %v2641_v31  ;;  %v2342_v31 = vld [vmem:[#allocation11 + $0x18] sm:$0xff] }
  0xed   :  { %1451 = vmatpush.bf16.msra.mxu2 %v2346_v33  ;;  %1477 = vmatpush.bf16.msrb.mxu0 %v2362_v45  ;;  %v319_v45 = vperm.slane %v2661_v61, 4 }
  0xee   :  { %1148 = vmatmul.bf16.vlgmr.msrb.gmra.mxu3 %v2643_v36  ;;  %1174 = vmatmul.bf16.vlgmr.msra.gmra.mxu1 %v2643_v36  ;;  %v2348_v36 = vld [vmem:[#allocation11 + $0x48] sm:$0xff] }
  0xef   :  { %1464 = vmatpush.bf16.msra.mxu3 %v2354_v32  ;;  %1490 = vmatpush.bf16.msrb.mxu1 %v2370_v34 }
  0xf1   :  { %1452 = vmatpush.bf16.msra.mxu2 %v2345_v37  ;;  %1478 = vmatpush.bf16.msrb.mxu0 %v2361_v48  ;;  %v322_v48 = vperm.slane %v2661_v61, 7 }
  0xf3   :  { %1465 = vmatpush.bf16.msra.mxu3 %v2353_v35  ;;  %1491 = vmatpush.bf16.msrb.mxu1 %v2369_v38 }
  0xf5   :  { %1453 = vmatpush.bf16.msra.mxu2 %v2344_v40  ;;  %1479 = vmatpush.bf16.msrb.mxu0 %v2360_v52 }
  0xf7   :  { %1466 = vmatpush.bf16.msra.mxu3 %v2352_v39  ;;  %1492 = vmatpush.bf16.msrb.mxu1 %v2368_v46 }
  0xf9   :  { %1454 = vmatpush.bf16.msra.mxu2 %v2343_v42  ;;  %1480 = vmatpush.bf16.msrb.mxu0 %v2359_v55  ;;  %v1503_v55 = vld [vmem:[%s2686_s6] sm:$0xf] }
  0xfb   :  { %1467 = vmatpush.bf16.msra.mxu3 %v2351_v41  ;;  %1493 = vmatpush.bf16.msrb.mxu1 %v2367_v50 }
  0xfd   :  { %1455 = vmatpush.bf16.msra.mxu2 %v2342_v31  ;;  %1481 = vmatpush.bf16.msrb.mxu0 %v2358_v57  ;;  %v1505_v57 = vperm.slane %v1503_v55, 0 }
  0xff   :  { %1468 = vmatpush.bf16.msra.mxu3 %v2350_v43  ;;  %1494 = vmatpush.bf16.msrb.mxu1 %v2366_v53 }
 0x101   :  { %1456 = vmatpush.bf16.msra.mxu2 %v2341_v47  ;;  %1482 = vmatpush.bf16.msrb.mxu0 %v2357_v59 }
 0x103   :  { %1469 = vmatpush.bf16.msra.mxu3 %v2349_v44  ;;  %1495 = vmatpush.bf16.msrb.mxu1 %v2365_v56 }
 0x105   :  { %1457 = vmatpush.bf16.msra.mxu2 %v2340_v51  ;;  %1483 = vmatpush.bf16.msrb.mxu0 %v2356_v62  ;;  %v1506_v62 = vperm.slane %v1503_v55, 1 }
 0x107   :  { %1470 = vmatpush.bf16.msra.mxu3 %v2348_v36  ;;  %1496 = vmatpush.bf16.msrb.mxu1 %v2364_v58  ;;  %v320_v36 = vperm.slane %v2661_v61, 5 }
 0x109   :  { %1458 = vmatpush.bf16.msra.mxu2 %v2339_v54  ;;  %1484 = vmatpush.bf16.msrb.mxu0 %v2355_v0  ;;  %v321_v54 = vperm.slane %v2661_v61, 6 }
 0x10b   :  { %1471 = vmatpush.bf16.msra.mxu3 %v2347_v49  ;;  %1497 = vmatpush.bf16.msrb.mxu1 %v2363_v60 }
 0x128   :  { %v1006_v1 = vpop.f32.mrf.mxu0 }
 0x129   :  { %v1007_v2 = vadd.f32 %v1006_v1, %v316_v63 }
 0x12b   :  { %v1019_v3 = vpop.f32.mrf.mxu1 }
 0x12c   :  { %v1020_v4 = vadd.f32 %v1019_v3, %v1007_v2  ;;  %v1507_v3 = vperm.slane %v1503_v55, 2 }
 0x12e   :  { %v1180_v6 = vmax.f32 %v1020_v4, 0.0  ;;  %v980_v7 = vpop.f32.mrf.mxu2 }
 0x12f   :  { %v981_v9 = vadd.f32 %v980_v7, %v315_v5 }
 0x130   :  { %v1188_v8 = vpack.c.bf16 %v1180_v6, %v1180_v6  ;;  %v1008_v11 = vpop.f32.mrf.mxu0 }
 0x131   :  { %v993_v10 = vpop.f32.mrf.mxu3 }
 0x132   :  { %v994_v12 = vadd.f32 %v993_v10, %v981_v9  ;;  %1472 = vmatmul.bf16.vlgmr.msra.gmra.mxu3 %v1188_v8  ;;  %v1508_v8 = vperm.slane %v1503_v55, 3 }
 0x133   :  { %v1021_v13 = vpop.f32.mrf.mxu1 }
 0x134   :  { %v1179_v14 = vmax.f32 %v994_v12, 0.0 }
 0x136   :  { %v1187_v15 = vpack.c.bf16 %v1179_v14, %v1179_v14  ;;  %v982_v17 = vpop.f32.mrf.mxu2 }
 0x138   :  { %1459 = vmatmul.bf16.vlgmr.msra.gmra.mxu2 %v1187_v15 }
 0x139   :  { %v995_v18 = vpop.f32.mrf.mxu3  ;;  %v1058_v19 = vpop.f32.mrf.mxu0 }
 0x13a   :  { %v1059_v20 = vadd.f32 %v1058_v19, %v318_v16 }
 0x13b   :  { %v1071_v21 = vpop.f32.mrf.mxu1 }
 0x13c   :  { %v1072_v22 = vadd.f32 %v1071_v21, %v1059_v20 }
 0x13e   :  { %v1182_v24 = vmax.f32 %v1072_v22, 0.0 }
 0x13f   :  { %v1032_v25 = vpop.f32.mrf.mxu2 }
 0x140   :  { %v1190_v26 = vpack.c.bf16 %v1182_v24, %v1182_v24  ;;  %v1033_v27 = vadd.f32 %v1032_v25, %v317_v23  ;;  %v2384_v24 = vld [vmem:[%s2687_s7] ss:$0 sm:$0xff] }
 0x141   :  { %v1045_v28 = vpop.f32.mrf.mxu3  ;;  %v1060_v29 = vpop.f32.mrf.mxu0 }
 0x142   :  { %v1046_v30 = vadd.f32 %v1045_v28, %v1033_v27  ;;  %1498 = vmatmul.bf16.vlgmr.msrb.gmra.mxu1 %v1190_v26  ;;  %v1522_v26 = vlaneseq }
 0x143   :  { %v1073_v32 = vpop.f32.mrf.mxu1 }
 0x144   :  { %v1181_v33 = vmax.f32 %v1046_v30, 0.0  ;;  %v1523_v29 = vand.u32 127, %v1522_v26 }
 0x146   :  { %v1189_v34 = vpack.c.bf16 %v1181_v33, %v1181_v33  ;;  %vm1524_vm1 = vcmp.eq.s32.totalorder %v1523_v29, 8 }
 0x147   :  { %v1034_v35 = vpop.f32.mrf.mxu2 }
 0x148   :  { %1485 = vmatmul.bf16.vlgmr.msrb.gmra.mxu0 %v1189_v34 }
 0x149   :  { %v1047_v37 = vpop.f32.mrf.mxu3  ;;  %v1110_v38 = vpop.f32.mrf.mxu0 }
 0x14a   :  { %v1111_v47 = vadd.f32 %v1110_v38, %v320_v36 }
 0x14b   :  { %v1123_v39 = vpop.f32.mrf.mxu1 }
 0x14c   :  { %v1124_v52 = vadd.f32 %v1123_v39, %v1111_v47 }
 0x14e   :  { %v1184_v60 = vmax.f32 %v1124_v52, 0.0 }
 0x14f   :  { %v1084_v40 = vpop.f32.mrf.mxu2 }
 0x150   :  { %v1085_v46 = vadd.f32 %v1084_v40, %v319_v45  ;;  %v1514_v6 = vmul.f32 %v1506_v62, %v1184_v60 }
 0x151   :  { %v1097_v41 = vpop.f32.mrf.mxu3  ;;  %v1112_v42 = vpop.f32.mrf.mxu0 }
 0x152   :  { %v1098_v49 = vadd.f32 %v1097_v41, %v1085_v46 }
 0x153   :  { %v1125_v43 = vpop.f32.mrf.mxu1 }
 0x154   :  { %v1183_v56 = vmax.f32 %v1098_v49, 0.0 }
 0x156   :  { %v1513_v1 = vmul.f32 %v1505_v57, %v1183_v56 }
 0x157   :  { %v1086_v44 = vpop.f32.mrf.mxu2 }
 0x158   :  { %v1517_v10 = vadd.f32 %v1514_v6, %v1513_v1 }
 0x159   :  { %v1099_v31 = vpop.f32.mrf.mxu3 }
 0x169   :  { %v1162_v50 = vpop.f32.mrf.mxu0 }
 0x16a   :  { %v1163_v53 = vadd.f32 %v1162_v50, %v322_v48 }
 0x16b   :  { %v1175_v51 = vpop.f32.mrf.mxu1 }
 0x16c   :  { %v1176_v63 = vadd.f32 %v1175_v51, %v1163_v53 }
 0x16e   :  { %v1186_v7 = vmax.f32 %v1176_v63, 0.0 }
 0x16f   :  { %v1136_v58 = vpop.f32.mrf.mxu2 }
 0x170   :  { %v1137_v0 = vadd.f32 %v1136_v58, %v321_v54  ;;  %v1516_v13 = vmul.f32 %v1508_v8, %v1186_v7 }
 0x171   :  { %v1149_v59 = vpop.f32.mrf.mxu3  ;;  %v1164_v4 = vpop.f32.mrf.mxu0 }
 0x172   :  { %v1150_v2 = vadd.f32 %v1149_v59, %v1137_v0 }
 0x173   :  { %v1177_v5 = vpop.f32.mrf.mxu1 }
 0x174   :  { %v1185_v61 = vmax.f32 %v1150_v2, 0.0 }
 0x176   :  { %v1515_v9 = vmul.f32 %v1507_v3, %v1185_v61 }
 0x177   :  { %v1138_v11 = vpop.f32.mrf.mxu2 }
 0x178   :  { %v1518_v14 = vadd.f32 %v1517_v10, %v1515_v9 }
 0x179   :  { %v1151_v12 = vpop.f32.mrf.mxu3 }
 0x17a   :  { %v1519_v15 = vadd.f32 %v1518_v14, %v1516_v13 }
 0x17c   :  { %1520 = vadd.xlane.f32.xlu0 %v1519_v15 }
 0x1b5   :  { %v1473_v16 = vpop.f32.mrf.mxu3 }
 0x1bb   :  { %v1460_v17 = vpop.f32.mrf.mxu2 }
 0x1bc   :  { %v1461_v25 = vadd.f32 %v2384_v24, %v1460_v17 }
 0x1bd   :  { %v1475_v18 = vpop.f32.mrf.mxu3 }
 0x1be   :  { %v1474_v27 = vadd.f32 %v1473_v16, %v1461_v25 }
 0x1bf   :  { %v1499_v19 = vpop.f32.mrf.mxu1 }
 0x1c3   :  { %v1462_v20 = vpop.f32.mrf.mxu2 }
 0x1c5   :  { %v1486_v21 = vpop.f32.mrf.mxu0 }
 0x1c6   :  { %v1487_v28 = vadd.f32 %v1486_v21, %v1474_v27 }
 0x1c7   :  { %v1501_v22 = vpop.f32.mrf.mxu1 }
 0x1c8   :  { %v1500_v30 = vadd.f32 %v1499_v19, %v1487_v28 }
 0x1cd   :  { %v1488_v23 = vpop.f32.mrf.mxu0 }
 0x1ef   :  { %v1521_v32 = vpop.xlane.xlu0 %1520 }
 0x1f0   :  { %v1525_v33 = vadd.f32 %v1521_v32, %v1500_v30 }
 0x1f2   :  { %v1526_v34 = vsel %vm1524_vm1, %v1525_v33, %v1500_v30 }
 0x1f3   :  { %v1527_v35 = vmax.f32 %v1526_v34, 0.0 }
 0x1f5   :  { %1528 = vst [vmem:[#allocation13] sm:$0xff] %v1527_v35 }
 0x1f6   :  { %1539 = dma.vmem_to_hbm [thread:$0]  %s1535_s17, 128, %s1537_s19, [#allocation4]  }
 0x1f7   :  { %2561 = dma.done.wait [#allocation4], 128  }
 0x1f8   :  { %2562 = vsyncadd [#allocation4], 4294967168 }
 0x1f9   :  { %1544 = vsyncpa [#allocation3], 1 }
 0x1fa   :  { %1545 = vsyncpa [#allocation6], 1 }
 0x1fb   :  { %1546 = vsyncpa [#allocation9], 1 }
 0x1fc   :  { %1547 = vsyncpa [#allocation12], 1 }
 0x1fd   :  { %1548 = vsyncpa [#allocation4], 1 }

</bundles_post_ra>
